<compile_context>
chip_gen: v6e
topology: v6e:2x2x1
jax: 0.10.0
libtpu: 0.0.40
codegen_flags: <defaults>
</compile_context>

<pallas_src>
import functools
import math

import numpy as np
import jax
import jax.numpy as jnp
from jax import lax
from jax.experimental import pallas as pl
from jax.experimental.pallas import tpu as pltpu


_BIG = 1e30


def _pick_tile(total, pref):
    """Largest multiple of 128 that divides `total` and is <= pref (else full)."""
    if total <= pref or total % 128 != 0:
        return total
    t = (pref // 128) * 128
    while t >= 128:
        if total % t == 0:
            return t
        t -= 128
    return total


def _pick_rows(total, pref):
    """Largest divisor of `total` that is a multiple of 8 and <= pref, else full."""
    if total <= pref:
        return total
    for s in range(pref, 7, -1):
        if total % s == 0 and s % 8 == 0:
            return s
    return total


# ----------------------------------------------------------------------------
# Kernel 1: argmax over classes -> one-hot        (N, C, HW) -> (N, C, HW)
# (softmax dropped: argmax is invariant under softmax, output is bit-identical)
# Layout: HW split as (rows, 128) so per-class tiles use all 8 sublanes.
# ----------------------------------------------------------------------------
def _argmax_onehot_kernel(x_ref, o_ref, *, SUB):
    C = x_ref.shape[1]
    S = x_ref.shape[2]
    for s0 in range(0, S, SUB):                         # bounded-vreg sub-blocks
        x = x_ref[0, :, s0:s0 + SUB, :]                 # (C, SUB, 128)
        best = x[0]                                     # (SUB, 128)
        best_idx = jnp.zeros(best.shape, jnp.int32)
        for c in range(1, C):                           # first max wins (np.argmax)
            cur = x[c]
            take = cur > best
            best = jnp.where(take, cur, best)
            best_idx = jnp.where(take, jnp.int32(c), best_idx)
        cls = lax.broadcasted_iota(jnp.int32, (C, SUB, 128), 0)
        o_ref[0, :, s0:s0 + SUB, :] = (cls == best_idx[None]).astype(jnp.float32)


def argmax_onehot(logits_flat, rows_per_step=128):
    """logits_flat: (N, C, HW) f32 -> (N, C, HW) f32 one-hot of per-pixel argmax."""
    N, C, HW = logits_flat.shape
    assert HW % 128 == 0, "H*W must be a multiple of 128"
    R = HW // 128
    S = _pick_rows(R, rows_per_step)
    if S % 16 == 0:
        SUB = 16
    elif S % 8 == 0:
        SUB = 8
    else:
        SUB = S
    x4 = logits_flat.reshape(N, C, R, 128)
    out = pl.pallas_call(
        functools.partial(_argmax_onehot_kernel, SUB=SUB),
        out_shape=jax.ShapeDtypeStruct((N, C, R, 128), jnp.float32),
        grid=(N, R // S),
        in_specs=[pl.BlockSpec((1, C, S, 128), lambda i, s: (i, 0, s, 0))],
        out_specs=pl.BlockSpec((1, C, S, 128), lambda i, s: (i, 0, s, 0)),
        compiler_params=pltpu.CompilerParams(
            dimension_semantics=("parallel", "parallel")),
    )(x4)
    return out.reshape(N, C, HW)


# ----------------------------------------------------------------------------
# Kernel 2: directed min-distance maps (tiled).
# For every pixel p and group g:  out[g, p] = min_{q : mask[g,q]==1} ||p - q||_2
# (== np.min(cdist(all_pixels, argwhere(mask[g])), axis=1))
# ----------------------------------------------------------------------------
def _min_dist_kernel(mask_ref, o_ref, d2_ref, pen_ref, acc_ref, *,
                     W, TILE_P, TILE_Q, GB, QCB, MASK_RESIDENT):
    p_idx = pl.program_id(1)
    q_idx = pl.program_id(2)

    @pl.when(q_idx == 0)
    def _():
        acc_ref[...] = jnp.full(acc_ref.shape, _BIG, dtype=jnp.float32)

    # --- group-independent squared distances for this (p, q) tile -----------
    # Coordinates generated in-kernel (no HBM coordinate inputs).  Computed in
    # QCB-wide column blocks (small intermediates), written once into a VMEM
    # scratch and re-read from the vld slot by every group below.
    p_lin = p_idx * TILE_P + lax.broadcasted_iota(jnp.int32, (TILE_P, 1), 0)
    rp = (p_lin // W).astype(jnp.float32)                 # (TILE_P, 1)
    cp = (p_lin % W).astype(jnp.float32)
    for c0 in range(0, TILE_Q, QCB):
        q_lin = (q_idx * TILE_Q + c0
                 + lax.broadcasted_iota(jnp.int32, (1, QCB), 1))
        rq = (q_lin // W).astype(jnp.float32)              # (1, QCB)
        cq = (q_lin % W).astype(jnp.float32)
        dr = rp - rq
        dc = cp - cq
        d2_ref[:, c0:c0 + QCB] = dr * dr + dc * dc

    # --- per-group penalty rows, computed once per grid step ----------------
    if MASK_RESIDENT:
        q_start = pl.multiple_of(q_idx * TILE_Q, TILE_Q)
        mask_blk = mask_ref[:, pl.ds(q_start, TILE_Q)]     # (GB, TILE_Q)
    else:
        mask_blk = mask_ref[...]                           # (GB, TILE_Q)
    pen_ref[...] = (1.0 - mask_blk) * jnp.float32(_BIG)

    n_chunks = TILE_Q // 128

    # --- fold: lane-wise running min; d2 reused across all groups -----------
    # TODO(synk): a stride-0 sublane-broadcast load of the penalty chunk
    # (pl.ds(g, TILE_P, stride=0)) could move the (1,128)->(TILE_P,128)
    # broadcast off the VALU path; kept as a plain broadcast-add for safety.
    def group_body(g, carry):
        folded = (d2_ref[:, 0:128]
                  + pen_ref[pl.ds(g, 1), pl.ds(0, 128)])   # (TILE_P, 128)
        for c in range(1, n_chunks):
            folded = jnp.minimum(
                folded,
                d2_ref[:, c * 128:(c + 1) * 128]
                + pen_ref[pl.ds(g, 1), pl.ds(c * 128, 128)])
        acc_ref[g] = jnp.minimum(acc_ref[g], folded)       # one RMW per q step
        return carry

    lax.fori_loop(0, GB, group_body, 0, unroll=2)

    # --- epilogue: single cross-lane min + sqrt per p-tile -------------------
    @pl.when(q_idx == pl.num_programs(2) - 1)
    def _():
        o_ref[...] = jnp.sqrt(jnp.min(acc_ref[...], axis=-1))


def directed_min_dist_maps(masks, H, W, group_block=16, tile_p=128, tile_q=4096,
                           vmem_budget_bytes=24 * 2 ** 20):
    """masks: (G, H*W) f32 in {0,1}.  Returns (G, H*W) f32 min-distance maps."""
    G, HW = masks.shape
    assert HW == H * W
    assert HW % 128 == 0, "H*W must be a multiple of 128"
    # TODO(synk): ragged H*W (not a multiple of 128 / awkward factorization)
    # would need masked tail tiles instead of requiring divisibility.

    GB = group_block
    TILE_P = _pick_tile(HW, tile_p)
    TILE_Q = _pick_tile(HW, tile_q)

    def resident_ok(gb):
        return gb * HW * 4 * 2 <= 6 * 2 ** 20            # double-buffered mask block

    def estimate(gb, tp, tq, resident):
        d2 = tp * tq * 4
        acc = gb * tp * 128 * 4
        pen = gb * tq * 4
        mask = gb * (HW if resident else tq) * 4 * 2
        out = gb * tp * 4 * 2
        tmp = tp * min(tq, 512) * 4 * 3                   # dr/dc transients
        return d2 + acc + pen + mask + out + tmp

    # v7x-safe budget: shrink TILE_Q, then group_block, until the estimate fits.
    while True:
        mask_resident = resident_ok(GB)
        if estimate(GB, TILE_P, TILE_Q, mask_resident) <= vmem_budget_bytes:
            break
        new_q = _pick_tile(HW, TILE_Q // 2) if TILE_Q > 512 else TILE_Q
        if new_q < TILE_Q:
            TILE_Q = new_q
        elif GB > 8:
            GB //= 2
        else:
            break
    mask_resident = resident_ok(GB)
    est = estimate(GB, TILE_P, TILE_Q, mask_resident)

    Gp = -(-G // GB) * GB
    if Gp != G:
        masks = jnp.concatenate([masks, jnp.zeros((Gp - G, HW), masks.dtype)], 0)

    QCB = math.gcd(TILE_Q, 512)

    if mask_resident:
        mask_spec = pl.BlockSpec((GB, HW), lambda g, p, q: (g, 0))
    else:
        mask_spec = pl.BlockSpec((GB, TILE_Q), lambda g, p, q: (g, q))

    steps = (Gp // GB) * (HW // TILE_P) * (HW // TILE_Q)
    flops = steps * (TILE_P * TILE_Q * (5 + 2 * GB) + GB * TILE_P * 128 * 2)
    if mask_resident:
        bytes_acc = Gp * HW * 4 + Gp * HW * 4
    else:
        bytes_acc = Gp * HW * 4 * (HW // TILE_P) + Gp * HW * 4

    kernel = functools.partial(_min_dist_kernel, W=W, TILE_P=TILE_P,
                               TILE_Q=TILE_Q, GB=GB, QCB=QCB,
                               MASK_RESIDENT=mask_resident)
    out = pl.pallas_call(
        kernel,
        out_shape=jax.ShapeDtypeStruct((Gp, HW), jnp.float32),
        grid=(Gp // GB, HW // TILE_P, HW // TILE_Q),
        in_specs=[mask_spec],
        out_specs=pl.BlockSpec((GB, TILE_P), lambda g, p, q: (g, p)),
        scratch_shapes=[pltpu.VMEM((TILE_P, TILE_Q), jnp.float32),   # d2
                        pltpu.VMEM((GB, TILE_Q), jnp.float32),       # penalties
                        pltpu.VMEM((GB, TILE_P, 128), jnp.float32)], # running min
        compiler_params=pltpu.CompilerParams(
            dimension_semantics=("parallel", "parallel", "arbitrary"),
            vmem_limit_bytes=int(min(max(2 * est, 32 * 2 ** 20), 48 * 2 ** 20))),
        cost_estimate=pl.CostEstimate(flops=int(flops),
                                      transcendentals=int(Gp * HW),
                                      bytes_accessed=int(bytes_acc)),
    )(masks)
    return out[:G]


# ----------------------------------------------------------------------------
# Module
# ----------------------------------------------------------------------------
class AllHausdorffDistances:
    def __init__(self, PARAMS):
        try:
            self.num_classes = PARAMS['NUM_CLASSES']
        except KeyError:
            self.num_classes = PARAMS['NUM_CLASSES_MASKS']
        self.percentiles = PARAMS['TRUNCATED_HAUSDORFF_PERCENTILES']
        self.ignore_class_index = PARAMS['HD_IGNORE_CLASS_INDEX']

    # ---- device part (Pallas kernels) ----
    def run_kernels(self, predictions, labels):
        N, C, H, W = predictions.shape
        HW = H * W
        pred_onehot = argmax_onehot(
            jnp.asarray(predictions, jnp.float32).reshape(N, C, HW))
        A = pred_onehot.reshape(N * C, HW)                       # prediction masks
        B = jnp.asarray(labels, jnp.float32).reshape(N * C, HW)  # label masks
        # first half: min dist of every pixel to the label set B  (-> "forward")
        # second half: min dist of every pixel to the prediction set A (-> "reverse")
        # TODO(synk): for large images a separable Euclidean distance transform
        # (O(HW)) should replace this O(HW^2) brute force.
        maps = directed_min_dist_maps(jnp.concatenate([B, A], axis=0), H, W)
        return pred_onehot, maps

    # ---- host glue, mirrors Hausdorff_Dist of the reference exactly ----
    def finish(self, pred_onehot, maps, labels):
        N, C, H, W = labels.shape
        HW = H * W
        A_data = np.asarray(pred_onehot).reshape(N, C, H, W)
        B_data = np.asarray(labels, dtype=np.float32)
        maps_np = np.asarray(maps)
        fwd_map = maps_np[:N * C].reshape(N, C, HW)   # dist to label set
        rev_map = maps_np[N * C:].reshape(N, C, HW)   # dist to prediction set

        P = len(self.percentiles)
        MHD = np.zeros((2 + P, self.num_classes + 2), dtype=np.float32)
        FHD = np.zeros((2 + P, self.num_classes + 2), dtype=np.float32)
        RHD = np.zeros((2 + P, self.num_classes + 2), dtype=np.float32)
        batch_counter = 0
        for i in range(N):
            for j in range(self.num_classes):
                if j == self.ignore_class_index:
                    continue
                a_sel = (A_data[i, j].reshape(-1) == 1)
                b_sel = (B_data[i, j].reshape(-1) == 1)
                if a_sel.sum() == 0 or b_sel.sum() == 0:
                    batch_counter -= 1
                    break
                forward = fwd_map[i, j][a_sel]   # == np.min(cdist(A,B), axis=1)
                reverse = rev_map[i, j][b_sel]   # == np.min(cdist(A,B), axis=0)
                forward_max = np.max(forward)
                reverse_max = np.max(reverse)
                FHD[0, j] += forward_max
                RHD[0, j] += reverse_max
                MHD[0, j] += np.max(np.array([forward_max, reverse_max]))
                forward_mean = np.mean(forward)
                reverse_mean = np.mean(reverse)
                FHD[1, j] += forward_mean
                RHD[1, j] += reverse_mean
                MHD[1, j] += np.max(np.array([forward_mean, reverse_mean]))
                # TODO(synk): np.percentile over variable-length point sets has no
                # clean fixed-shape Pallas equivalent; kept in host NumPy (as in ref).
                fp = np.zeros(shape=P)
                rp = np.zeros(shape=P)
                for k in range(P):
                    fp[k] = np.percentile(forward, self.percentiles[k])
                    rp[k] = np.percentile(reverse, self.percentiles[k])
                FHD[2:, j] += fp
                FHD[2:, j] += rp              # (reproduces reference: RHD[2:] untouched)
                MHD[2:, j] += np.max(np.array([fp, rp]), axis=0)
            batch_counter += 1
        FHD[:, :-2] /= batch_counter
        FHD[:, -2] = np.mean(FHD[:, :-2], axis=1)
        FHD[:, -1] = np.mean(FHD[:, 1:-2], axis=1)
        RHD[:, :-2] /= batch_counter
        RHD[:, -2] = np.mean(RHD[:, :-2], axis=1)
        RHD[:, -1] = np.mean(RHD[:, 1:-2], axis=1)
        MHD[:, :-2] /= batch_counter
        MHD[:, -2] = np.mean(MHD[:, :-2], axis=1)
        MHD[:, -1] = np.mean(MHD[:, 1:-2], axis=1)
        return (MHD, FHD, RHD)

    def __call__(self, predictions, labels):
        pred_onehot, maps = self.run_kernels(predictions, labels)
        jax.block_until_ready((pred_onehot, maps))
        return self.finish(pred_onehot, maps, labels)


# ----------------------------------------------------------------------------
# Pure-NumPy reference for the kernel outputs (sanity check only).
# ----------------------------------------------------------------------------
def _ref_min_dist_maps(masks_np, H, W):
    G, HW = masks_np.shape
    idx = np.arange(HW)
    coords = np.stack([idx // W, idx % W], axis=1).astype(np.float64)
    out = np.full((G, HW), np.nan)
    for g in range(G):
        sel = masks_np[g] == 1
        if not sel.any():
            continue
        tgt = coords[sel]
        d = np.sqrt(((coords[:, None, :] - tgt[None, :, :]) ** 2).sum(-1))
        out[g] = d.min(axis=1)
    return out


if __name__ == "__main__":
    PARAMS = {
        'NUM_CLASSES': 4,
        'TRUNCATED_HAUSDORFF_PERCENTILES': [90.0, 95.0],
        'HD_IGNORE_CLASS_INDEX': 0,
    }
    N, C, H, W = 2, 4, 16, 16
    key = jax.random.PRNGKey(0)
    k1, k2 = jax.random.split(key)
    logits = jax.random.normal(k1, (N, C, H, W), dtype=jnp.float32)      # predictions
    label_idx = jax.random.randint(k2, (N, H, W), 0, C)
    labels = jax.nn.one_hot(label_idx, C, axis=1, dtype=jnp.float32)     # (N, C, H, W)

    module = AllHausdorffDistances(PARAMS)

    # run the kernels once and block on the device results
    pred_onehot, maps = module.run_kernels(logits, labels)
    jax.block_until_ready((pred_onehot, maps))

    # --- correctness checks against NumPy reference ---
    logits_np = np.asarray(logits)
    sm = np.exp(logits_np - logits_np.max(axis=1, keepdims=True))
    sm = sm / sm.sum(axis=1, keepdims=True)
    ref_oh = np.eye(C, dtype=np.float32)[np.argmax(sm, axis=1)].transpose(0, 3, 1, 2)
    np.testing.assert_array_equal(np.asarray(pred_onehot).reshape(N, C, H, W), ref_oh)

    masks_np = np.concatenate(
        [np.asarray(labels).reshape(N * C, H * W),
         ref_oh.reshape(N * C, H * W)], axis=0)
    ref_maps = _ref_min_dist_maps(masks_np, H, W)
    got_maps = np.asarray(maps)
    valid = ~np.isnan(ref_maps)
    np.testing.assert_allclose(got_maps[valid], ref_maps[valid], rtol=1e-4, atol=1e-4)

    # full forward pass (kernel outputs + host bookkeeping identical to reference)
    MHD, FHD, RHD = module.finish(pred_onehot, maps, labels)
    assert MHD.shape == FHD.shape == RHD.shape == (2 + 2, PARAMS['NUM_CLASSES'] + 2)
    assert MHD.dtype == FHD.dtype == RHD.dtype == np.float32
    assert np.all(np.isfinite(MHD)) and np.all(np.isfinite(FHD)) and np.all(np.isfinite(RHD))

    print("KERNEL_OK")
</pallas_src>

<mosaic_0001>
module attributes {stable_mosaic.version = 11 : i64} {
  func.func @_argmax_onehot_kernel(%arg0: i32, %arg1: i32, %arg2: memref<1x4x2x128xf32, #tpu.memory_space<vmem>>, %arg3: memref<1x4x2x128xf32, #tpu.memory_space<vmem>>) attributes {dimension_semantics = [#tpu.dimension_semantics<parallel>, #tpu.dimension_semantics<parallel>], iteration_bounds = array<i64: 2, 1>, scalar_prefetch = 0 : i64, scratch_operands = 0 : i64, tpu.core_type = #tpu.core_type<tc>, window_params = [{transform_indices = @transform_0, window_bounds = array<i64: 1, 4, 2, 128>}, {transform_indices = @transform_1, window_bounds = array<i64: 1, 4, 2, 128>}]} {
    %c0 = arith.constant 0 : index
    %c0_0 = arith.constant 0 : index
    %c0_1 = arith.constant 0 : index
    %c0_2 = arith.constant 0 : index
    %0 = vector.load %arg2[%c0, %c0_0, %c0_1, %c0_2] : memref<1x4x2x128xf32, #tpu.memory_space<vmem>>, vector<1x4x2x128xf32>
    %1 = vector.shape_cast %0 : vector<1x4x2x128xf32> to vector<4x2x128xf32>
    %2 = vector.extract_strided_slice %1 {offsets = [0, 0, 0], sizes = [1, 2, 128], strides = [1, 1, 1]} : vector<4x2x128xf32> to vector<1x2x128xf32>
    %3 = vector.shape_cast %2 : vector<1x2x128xf32> to vector<2x128xf32>
    %c0_i32 = arith.constant 0 : i32
    %4 = vector.broadcast %c0_i32 : i32 to vector<2x128xi32>
    %5 = vector.extract_strided_slice %1 {offsets = [1, 0, 0], sizes = [1, 2, 128], strides = [1, 1, 1]} : vector<4x2x128xf32> to vector<1x2x128xf32>
    %6 = vector.shape_cast %5 : vector<1x2x128xf32> to vector<2x128xf32>
    %7 = arith.cmpf ogt, %6, %3 : vector<2x128xf32>
    %8 = arith.select %7, %6, %3 : vector<2x128xi1>, vector<2x128xf32>
    %c1_i32 = arith.constant 1 : i32
    %9 = vector.broadcast %c1_i32 : i32 to vector<2x128xi32>
    %10 = arith.select %7, %9, %4 : vector<2x128xi1>, vector<2x128xi32>
    %11 = vector.extract_strided_slice %1 {offsets = [2, 0, 0], sizes = [1, 2, 128], strides = [1, 1, 1]} : vector<4x2x128xf32> to vector<1x2x128xf32>
    %12 = vector.shape_cast %11 : vector<1x2x128xf32> to vector<2x128xf32>
    %13 = arith.cmpf ogt, %12, %8 : vector<2x128xf32>
    %14 = arith.select %13, %12, %8 : vector<2x128xi1>, vector<2x128xf32>
    %c2_i32 = arith.constant 2 : i32
    %15 = vector.broadcast %c2_i32 : i32 to vector<2x128xi32>
    %16 = arith.select %13, %15, %10 : vector<2x128xi1>, vector<2x128xi32>
    %17 = vector.extract_strided_slice %1 {offsets = [3, 0, 0], sizes = [1, 2, 128], strides = [1, 1, 1]} : vector<4x2x128xf32> to vector<1x2x128xf32>
    %18 = vector.shape_cast %17 : vector<1x2x128xf32> to vector<2x128xf32>
    %19 = arith.cmpf ogt, %18, %14 : vector<2x128xf32>
    %c3_i32 = arith.constant 3 : i32
    %20 = vector.broadcast %c3_i32 : i32 to vector<2x128xi32>
    %21 = arith.select %19, %20, %16 : vector<2x128xi1>, vector<2x128xi32>
    %22 = tpu.iota {dimensions = array<i32: 0>} : vector<4x2x128xi32>
    %23 = vector.shape_cast %21 : vector<2x128xi32> to vector<1x2x128xi32>
    %24 = vector.broadcast %23 : vector<1x2x128xi32> to vector<4x2x128xi32>
    %25 = arith.cmpi eq, %22, %24 : vector<4x2x128xi32>
    %26 = arith.extui %25 : vector<4x2x128xi1> to vector<4x2x128xi32>
    %27 = arith.sitofp %26 : vector<4x2x128xi32> to vector<4x2x128xf32>
    %c0_3 = arith.constant 0 : index
    %c0_4 = arith.constant 0 : index
    %c0_5 = arith.constant 0 : index
    %c0_6 = arith.constant 0 : index
    %28 = vector.load %arg3[%c0_3, %c0_4, %c0_5, %c0_6] : memref<1x4x2x128xf32, #tpu.memory_space<vmem>>, vector<1x4x2x128xf32>
    %29 = vector.shape_cast %28 : vector<1x4x2x128xf32> to vector<4x2x128xf32>
    %30 = vector.shape_cast %27 : vector<4x2x128xf32> to vector<1x4x2x128xf32>
    tpu.vector_store %arg3[%c0_3, %c0_4, %c0_5, %c0_6], %30 {strides = array<i32>} : memref<1x4x2x128xf32, #tpu.memory_space<vmem>>, vector<1x4x2x128xf32>,
    return
  }
  func.func @transform_0(%arg0: i32, %arg1: i32) -> (i32, i32, i32, i32) {
    %c0_i32 = arith.constant 0 : i32
    %c0_i32_0 = arith.constant 0 : i32
    %c0_i32_1 = arith.constant 0 : i32
    return %arg0, %c0_i32, %arg1, %c0_i32_0 : i32, i32, i32, i32
  }
  func.func @transform_1(%arg0: i32, %arg1: i32) -> (i32, i32, i32, i32) {
    %c0_i32 = arith.constant 0 : i32
    %c0_i32_0 = arith.constant 0 : i32
    %c0_i32_1 = arith.constant 0 : i32
    return %arg0, %c0_i32, %arg1, %c0_i32_0 : i32, i32, i32, i32
  }
}

</mosaic_0001>

<bundles_post_ra>
// kernel: tpu_custom_call.1
= control target key start
LH: loop header
LB: loop body
LE: loop exit
PB: predicated region body
PF: predicated region fallthrough
CT: control target
= control target key end

     0   :  { %6 = vsyncpa [#allocation3], 0  ;;  %s643_s0 = inlined_call_operand.hbm [shape: f32[2,4,2,128], index: 0, kind: input, shape index: {}]   ;;  %s644_s1 = inlined_call_operand.hbm [shape: f32[2,4,2,128], index: 1, kind: output, shape index: {}]  }
   0x1   :  { %8 = vsyncpa [#allocation3 + $0x1], 0 }
   0x2   :  { %9 = vsyncpa [#allocation4], 0 }
   0x3   :  { %11 = vsyncpa [#allocation4 + $0x1], 0  ;;  %s497_s6 = smov 0   ;;  %s499_s7 = smov 0  }
   0x4   :  { %s501_s8 = smov 0   ;;  %s503_s9 = smov 0  }
   0x5   :  { %s505_s10 = smov 0   ;;  %s507_s11 = smov 0  }
   0x6 LB: > { %s280_s12 = sadd.s32 4294967295, %s477_s11   ;;  %s281_s13 = sadd.s32 4294967294, %s477_s11   ;;  %s477_s11 = sphi %s507_s11, %s17_s11   ;;  %s473_s10 = sphi %s505_s10, %s655_s10   ;;  %s469_s9 = sphi %s503_s9, %s654_s9   ;;  %s465_s8 = sphi %s501_s8, %s653_s8   ;;  %s461_s7 = sphi %s499_s7, %s652_s7   ;;  %s457_s6 = sphi %s497_s6, %s651_s6  }
   0x7   : > { %s29_s14 = sadd.s32 1, %s473_s10  ;;  %s38_s15 = sadd.s32 1, %s465_s8 }
   0x8   : > { %p31_p0 = scmp.ge.s32.totalorder %s29_s14, 2  ;;  %p45_p1 = scmp.ne.s32.totalorder %s465_s8, %s461_s7 }
   0x9   : > { %p46_p2 = scmp.eq.s32.totalorder %s477_s11, 0  ;;  %p51_p3 = scmp.ne.s32.totalorder %s461_s7, %s457_s6 }
   0xa   : > { %s657_s14 = smov (%p31_p0, %s29_s14), 0  ;;  %p52_p5 = scmp.eq.s32.totalorder %s280_s12, 0 }
   0xb   : > { %p538_p4 = por %p46_p2, %p45_p1  ;;  %s33_s17 = ssub.s32 %s473_s10, %s657_s14 }
   0xc   : > { %p77_p6 = scmp.eq.s32.totalorder %s280_s12, 1  ;;  %p36_p7 = scmp.eq.s32.totalorder %s33_s17, 0 }
   0xd   : > { %p544_p8 = por %p52_p5, %p51_p3  ;;  %p83_p10 = scmp.eq.s32.totalorder %s281_s13, 1 }
   0xe   : > { %p548_p9 = por %p77_p6, %p45_p1  ;;  %p313_p13 = scmp.lt.s32.totalorder %s477_s11, 2 }
   0xf   : > { %s553_s20 = scalar_select %p36_p7, %s465_s8, %s38_s15  }
  0x10   : > { %p555_p11 = por %p83_p10, %p51_p3  ;;  %s103_s22 = sand.u32 1, %s465_s8  }
  0x11   : > { %s284_s23 = sshll.u32 %s103_s22, 3  ;;  %s299_s24 = sshll.u32 %s473_s10, 7 }
  0x12   : > { %s114_s27 = scalar_lea.hbm %s643_s0, %s299_s24  ;;  %s107_s28 = scalar_lea.vmem [#allocation2], %s284_s23 }
  0x13   : > { %s115_s29 = sshll.u32 %s107_s28, 4  ;;  %p568_p0 = pnand %p313_p13, %p538_p4  ;;  %s116_s29 = int_to_ptr.vmem [resolvable:$true] %s115_s29 }
  0x14   : > { %p287_p1 = scmp.ge.s32.totalorder %s477_s11, 1  ;;  %s104_s2 = scalar_lea.sflag [#allocation3], %s103_s22 }
  0x15   : > { %p371_p2 = pneg %p568_p0  ;;  %s382_s3 = scalar_lea.vmem %s116_s29, 128 }
  0x16   : > { %p383_p3 = scmp.ne.s32.totalorder %s116_s29, %s382_s3  ;;  %s479_s4 = smov [#allocation2]  }
  0x17   : > { %s387_s5 = sshll.u32 %s479_s4, 4  ;;  %s388_s5 = int_to_ptr.vmem [resolvable:$false] %s387_s5 }
  0x18   : > { %p385_p5 = pnand %p383_p3, %p371_p2  ;;  %s389_s12 = scalar_lea.vmem %s388_s5, 256 }
  0x19   : > { %p390_p7 = scmp.lt.s32.totalorder %s116_s29, %s388_s5  ;;  %p391_p10 = scmp.lt.s32.totalorder %s389_s12, %s382_s3 }
  0x1a   : > { %p386_p6 = pneg %p385_p5 }
  0x1b   : > { %p392_p12 = por %p391_p10, %p390_p7 }
  0x1d   : > { %p393_p4 = pnand %p392_p12, %p386_p6 }
  0x1f   : > { %396 = shalt.err (!%p393_p4)
}
  0x20   : > { %s480_s13 = smov 32   ;;  %s481_s15 = smov 2  }
  0x21   : > { %308 = dma.hbm_to_vmem [thread:$0]  (!%p568_p0), %s114_s27, 128, %s116_s29, %s104_s2, %s480_s13, %s480_s13, %s481_s15  }
  0x22   : > { %p123_p13 = scmp.lt.s32.totalorder %s477_s11, 3 }
  0x24   : > { %p124_p2 = pnand %p287_p1, %p123_p13 }
  0x25   : > { %s581_s16 = sand.u32 (!%p124_p2), 1, %s461_s7  }
  0x26   : > { %127 = sbr.rel (%p124_p2) target bundleno = 70 (0x46), region = 24  ;;  %s288_s17 = sshll.u32 (!%p124_p2), %s581_s16, 3 }
  0x27   : > { %s130_s22 = scalar_lea.sflag (!%p124_p2), [#allocation3], %s581_s16  ;;  %s133_s23 = scalar_lea.vmem (!%p124_p2), [#allocation2], %s288_s17 }
  0x2b   : > { %448 = dma.done.wait (%p544_p8), %s130_s22, 128  }
  0x2c   : > { %450 = vsyncadd (%p544_p8), %s130_s22, 4294967168  ;;  %v152_v0 = vld [vmem:[%s133_s23] sm:$0x3]  ;;  %v153_v1 = vld [vmem:[%s133_s23 + $0x2] sm:$0x3]  ;;  %v482_v5 = vmov 0  }
  0x2d   : > { %v154_v2 = vld [vmem:[%s133_s23 + $0x4] sm:$0x3]  ;;  %vm156_vm0 = vcmp.gt.f32.partialorder %v153_v1, %v152_v0  ;;  %v155_v3 = vld [vmem:[%s133_s23 + $0x6] sm:$0x3]  ;;  %s151_s24 = scalar_lea.vmem [#allocation5], %s288_s17  ;;  %s300_s26 = sshll.u32 %s469_s9, 7 }
  0x2e   : > { %v157_v4 = vsel %vm156_vm0, %v153_v1, %v152_v0  ;;  %v158_v6 = vsel %vm156_vm0, 1, %v482_v5  ;;  %s195_s25 = sshll.u32 %s151_s24, 4  ;;  %s595_s28 = scalar_lea.hbm %s644_s1, %s300_s26  ;;  %v483_v10 = vmov 0.0   ;;  %s590_s25 = int_to_ptr.vmem [resolvable:$true] %s195_s25 }
  0x2f   : > { %vm159_vm1 = vcmp.gt.f32.partialorder %v154_v2, %v157_v4  ;;  %s181_s9 = scalar_lea.sflag [#allocation4], %s581_s16  ;;  %s397_s29 = scalar_lea.vmem %s590_s25, 128 }
  0x30   : > { %v160_v7 = vsel %vm159_vm1, %v154_v2, %v157_v4  ;;  %v161_v8 = vsel %vm159_vm1, 2, %v158_v6  ;;  %p398_p8 = scmp.ne.s32.totalorder %s590_s25, %s397_s29  ;;  %s484_s30 = smov [#allocation5]  }
  0x31   : > { %vm162_vm2 = vcmp.gt.f32.partialorder %v155_v3, %v160_v7  ;;  %s401_s2 = sshll.u32 %s484_s30, 4  ;;  %s402_s2 = int_to_ptr.vmem [resolvable:$false] %s401_s2 }
  0x32   : > { %v163_v9 = vsel %vm162_vm2, 3, %v161_v8  ;;  %p399_p12 = pnand %p398_p8, %p548_p9  ;;  %s403_s3 = scalar_lea.vmem %s402_s2, 256 }
  0x33   : > { %vm164_vm3 = vcmp.eq.s32.totalorder %v163_v9, 0  ;;  %vm165_vm4 = vcmp.eq.s32.totalorder %v163_v9, 1  ;;  %vm166_vm5 = vcmp.eq.s32.totalorder %v163_v9, 2  ;;  %vm167_vm6 = vcmp.eq.s32.totalorder %v163_v9, 3  ;;  %p404_p1 = scmp.lt.s32.totalorder %s590_s25, %s402_s2  ;;  %p405_p3 = scmp.lt.s32.totalorder %s403_s3, %s397_s29 }
  0x34   : > { %v290_v11 = vsel %vm164_vm3, 1.0, %v483_v10  ;;  %v291_v12 = vsel %vm165_vm4, 1.0, %v483_v10  ;;  %v292_v13 = vsel %vm166_vm5, 1.0, %v483_v10  ;;  %v293_v14 = vsel %vm167_vm6, 1.0, %v483_v10  ;;  %p400_p0 = pneg %p399_p12 }
  0x35   : > { %176 = vst [vmem:[%s151_s24] sm:$0x3] %v290_v11  ;;  %177 = vst [vmem:[%s151_s24 + $0x2] sm:$0x3] %v291_v12  ;;  %p406_p5 = por %p405_p3, %p404_p1 }
  0x36   : > { %178 = vst [vmem:[%s151_s24 + $0x4] sm:$0x3] %v292_v13  ;;  %179 = vst [vmem:[%s151_s24 + $0x6] sm:$0x3] %v293_v14 }
  0x37   : > { %p407_p6 = pnand %p406_p5, %p400_p0 }
  0x39   : > { %410 = shalt.err (!%p407_p6)
}
  0x3a   : > { %s411_s4 = scalar_lea.hbm %s595_s28, 128  ;;  %s415_s13 = scalar_lea.hbm %s644_s1, 256 }
  0x3b   : > { %p412_p7 = scmp.ne.s32.totalorder %s595_s28, %s411_s4  ;;  %p416_p13 = scmp.lt.s32.totalorder %s595_s28, %s644_s1 }
  0x3c   : > { %p417_p2 = scmp.lt.s32.totalorder %s415_s13, %s411_s4 }
  0x3d   : > { %p413_p10 = pnand %p412_p7, %p548_p9 }
  0x3e   : > { %p418_p8 = por %p417_p2, %p416_p13 }
  0x3f   : > { %p414_p4 = pneg %p413_p10 }
  0x41   : > { %p419_p12 = pnand %p418_p8, %p414_p4 }
  0x43   : > { %422 = shalt.err (!%p419_p12)
}
  0x44   : > { %s485_s22 = smov 32   ;;  %s486_s23 = smov 2  }
  0x45   : > { %303 = dma.vmem_to_hbm [thread:$0]  (%p548_p9), %s590_s25, 128, %s595_s28, %s181_s9, %s485_s22, %s485_s22, %s486_s23  }
  0x46 PF: > { %s210_s24 = sand.u32 1, %s457_s6   ;;  %p650_p0 = scmp.ge.s32.totalorder %s477_s11, 2 }
  0x47   : > { %s211_s26 = scalar_lea.sflag [#allocation4], %s210_s24 }
  0x48   : > { %p310_p1 = pnand %p650_p0, %p555_p11 }
  0x4a   : > { %p311_p3 = pneg %p310_p1 }
  0x4c   : > { %452 = dma.done.wait (%p311_p3), %s211_s26, 128  }
  0x4d   : > { %454 = vsyncadd (%p311_p3), %s211_s26, 4294967168  ;;  %s17_s11 = sadd.s32 1, %s477_s11   ;;  %s651_s6 = smov %s461_s7 }
  0x4e   : > { %p14_p5 = scmp.ge.s32.totalorder %s17_s11, 4   ;;  %s652_s7 = smov %s465_s8 }
  0x4f   : > { %s653_s8 = smov %s553_s20  ;;  %s654_s9 = smov %s473_s10 }
  0x50   : > { %s655_s10 = smov %s657_s14  ;;  %16 = sbr.rel (!%p14_p5) target bundleno = 6 (0x6), region = 69 }
  0x55   :  { %216 = vsyncpa [#allocation3], 1 }
  0x56   :  { %218 = vsyncpa [#allocation3 + $0x1], 1 }
  0x57   :  { %219 = vsyncpa [#allocation4], 1 }
  0x58   :  { %221 = vsyncpa [#allocation4 + $0x1], 1 }

</bundles_post_ra>
